<compile_context>
chip_gen: v5e
topology: v5e:2x2
jax: 0.10.0
libtpu: 0.0.40
codegen_flags: <defaults>
</compile_context>

<pallas_src>
import functools

import jax
import jax.numpy as jnp
from jax.experimental import pallas as pl
from jax.experimental.pallas import tpu as pltpu


def _part_attention_kernel(x_ref, vals_ref, mask_ref, row_acc, *, L, H, N, k_top):
    # x_ref   : (1, 1, H, N, N) f32  -- block holding x[L-1-l] for batch b
    # vals_ref: (1, 1, k_top)   f32  -- top-k values of the LAST head (torch's `_`)
    # mask_ref: (1, 1, N)       i32  -- OR over heads of per-head top-k scatter masks
    # row_acc : (H, N)          f32  -- carried CLS-row-of-product, one row per head
    l = pl.program_id(1)

    # ---- chain step: row_h <- row_h @ x[L-1-l][h]  (CLS row only, per head) ---
    @pl.when(l == 0)
    def _init():
        for h in range(H):
            # e0^T @ x[L-1][h]  ==  row 0 of x[L-1][h]
            row_acc[h:h + 1, :] = x_ref[0, 0, h, 0:1, :]

    @pl.when(l != 0)
    def _step():
        rows = row_acc[...]                                   # (H, N) snapshot
        for h in range(H):                                    # static unroll over heads
            row_acc[h:h + 1, :] = jnp.dot(
                rows[h:h + 1, :], x_ref[0, 0, h],
                preferred_element_type=jnp.float32)

    # ---- finalize: head-vectorized iterative top-k + OR over heads -----------
    @pl.when(l == L - 1)
    def _finalize():
        col_ids = jax.lax.broadcasted_iota(jnp.int32, (H, N), 1)
        k_ids = jax.lax.broadcasted_iota(jnp.int32, (1, k_top), 1)

        rows = row_acc[...]                                   # (H, N)
        # exclude CLS column (torch indexes last_map[:, :, 0, 1:])
        rows = jnp.where(col_ids == 0, -jnp.inf, rows)

        def body(t, carry):
            rows, mask, vals = carry
            m = jnp.max(rows, axis=-1, keepdims=True)         # (H, 1)
            hit = rows == m
            # first (lowest-index) occurrence of the max -> deterministic ties
            idx = jnp.min(jnp.where(hit, col_ids, jnp.int32(N)),
                          axis=-1, keepdims=True)             # (H, 1) token index
            # torch scatters the *slice* index, i.e. token_index - 1
            mask = jnp.where(col_ids == idx - 1, 1.0, mask)
            rows = jnp.where(col_ids == idx, -jnp.inf, rows)
            # record the value only for the last head (the others are dead work)
            vals = jnp.where(k_ids == t, m[H - 1:H, :], vals)
            return rows, mask, vals

        carry0 = (rows,
                  jnp.zeros((H, N), jnp.float32),
                  jnp.zeros((1, k_top), jnp.float32))
        _, mask, vals = jax.lax.fori_loop(0, k_top, body, carry0)

        # OR over heads == max over axis 0 of the 0/1 masks
        mask_ref[...] = (jnp.max(mask, axis=0, keepdims=True)
                         .astype(jnp.int32).reshape(1, 1, N))
        vals_ref[...] = vals.reshape(1, 1, k_top)


def part_attention(x, ratio=0.5):
    """Pallas TPU forward of Part_Attention.

    x: stacked attention maps, shape (L, B, H, N, N) float32 (preferred), or a
       list/tuple of (B, H, N, N) maps (stacked once here as a fallback).
    Returns (topk_vals_of_last_head, token_mask) matching the PyTorch module:
      topk_vals : (B, int(N*ratio)) float32, descending
      token_mask: (B, N) bool
    """
    if isinstance(x, (list, tuple)):
        x = jnp.stack([jnp.asarray(xi, jnp.float32) for xi in x], axis=0)
    else:
        x = jnp.asarray(x, jnp.float32)
    L, B, H, N, _ = x.shape
    k_top = int(N * ratio)
    if not (1 <= k_top <= N - 1):
        raise ValueError("int(N*ratio) must lie in [1, N-1]")

    kernel = functools.partial(_part_attention_kernel, L=L, H=H, N=N, k_top=k_top)
    vals, mask = pl.pallas_call(
        kernel,
        out_shape=(
            jax.ShapeDtypeStruct((B, 1, k_top), jnp.float32),
            jax.ShapeDtypeStruct((B, 1, N), jnp.int32),
        ),
        grid_spec=pltpu.PrefetchScalarGridSpec(
            num_scalar_prefetch=0,
            grid=(B, L),
            in_specs=[
                # walk the chain from x[L-1] down to x[0]; one (H,N,N) slab/step
                pl.BlockSpec((1, 1, H, N, N),
                             lambda b, l: (L - 1 - l, b, 0, 0, 0)),
            ],
            out_specs=[
                pl.BlockSpec((1, 1, k_top), lambda b, l: (b, 0, 0)),
                pl.BlockSpec((1, 1, N), lambda b, l: (b, 0, 0)),
            ],
            scratch_shapes=[pltpu.VMEM((H, N), jnp.float32)],
        ),
        compiler_params=pltpu.CompilerParams(
            dimension_semantics=("parallel", "arbitrary")),
    )(x)
    return vals[:, 0, :], mask[:, 0, :].astype(bool)


def _reference(x, ratio=0.5):
    """Pure-JAX reference mirroring the PyTorch forward exactly."""
    L, B, H, N, _ = x.shape
    k_top = int(N * ratio)
    last = x[0]
    for i in range(1, L):
        last = jnp.einsum("bhij,bhjk->bhik", x[i], last)
    last = last[:, :, 0, 1:]                                  # (B, H, N-1)
    mask = jnp.zeros((B, N), bool)
    vals = None
    for h in range(H):
        vals, idx = jax.lax.top_k(last[:, h, :], k_top)
        head_mask = jnp.zeros((B, N), bool)
        head_mask = head_mask.at[jnp.arange(B)[:, None], idx].set(True)
        mask = mask | head_mask
    return vals, mask


if __name__ == "__main__":
    B, H, N, L = 2, 4, 16, 3
    ratio = 0.5

    key = jax.random.PRNGKey(0)
    # softmax-normalized maps, like real attention probabilities; pre-stacked.
    x = jax.nn.softmax(
        jax.random.normal(key, (L, B, H, N, N), jnp.float32), axis=-1)

    vals, mask = part_attention(x, ratio=ratio)
    vals = jax.block_until_ready(vals)
    mask = jax.block_until_ready(mask)

    ref_vals, ref_mask = _reference(x, ratio=ratio)

    assert vals.shape == (B, int(N * ratio)) and mask.shape == (B, N)
    assert bool(jnp.all(mask == ref_mask)), "token mask mismatch vs reference"
    assert bool(jnp.allclose(vals, ref_vals, rtol=1e-5, atol=1e-5)), \
        "top-k values mismatch vs reference"

    print("KERNEL_OK")
</pallas_src>

<mosaic_0001>
module attributes {stable_mosaic.version = 11 : i64} {
  func.func @_part_attention_kernel(%arg0: i32, %arg1: i32, %arg2: memref<1x1x4x16x16xf32, #tpu.memory_space<vmem>>, %arg3: memref<1x1x8xf32, #tpu.memory_space<vmem>>, %arg4: memref<1x1x16xi32, #tpu.memory_space<vmem>>, %arg5: memref<4x16xf32, #tpu.memory_space<vmem>>) attributes {dimension_semantics = [#tpu.dimension_semantics<parallel>, #tpu.dimension_semantics<arbitrary>], iteration_bounds = array<i64: 2, 3>, scalar_prefetch = 0 : i64, scratch_operands = 1 : i64, tpu.core_type = #tpu.core_type<tc>, window_params = [{transform_indices = @transform_0, window_bounds = array<i64: 1, 1, 4, 16, 16>}, {transform_indices = @transform_1, window_bounds = array<i64: 1, 1, 8>}, {transform_indices = @transform_2, window_bounds = array<i64: 1, 1, 16>}]} {
    %c0_i32 = arith.constant 0 : i32
    %0 = arith.cmpi eq, %arg1, %c0_i32 : i32
    %1 = arith.extui %0 : i1 to i32
    %c0_i32_0 = arith.constant 0 : i32
    %2 = arith.cmpi ne, %1, %c0_i32_0 : i32
    scf.if %2 {
      %c0 = arith.constant 0 : index
      %c0_4 = arith.constant 0 : index
      %c0_5 = arith.constant 0 : index
      %c0_6 = arith.constant 0 : index
      %c0_7 = arith.constant 0 : index
      %9 = vector.load %arg2[%c0, %c0_4, %c0_5, %c0_6, %c0_7] : memref<1x1x4x16x16xf32, #tpu.memory_space<vmem>>, vector<1x1x1x1x16xf32>
      %10 = vector.shape_cast %9 : vector<1x1x1x1x16xf32> to vector<1x16xf32>
      %c0_8 = arith.constant 0 : index
      %c0_9 = arith.constant 0 : index
      %11 = vector.load %arg5[%c0_8, %c0_9] : memref<4x16xf32, #tpu.memory_space<vmem>>, vector<1x16xf32>
      tpu.vector_store %arg5[%c0_8, %c0_9], %10 {strides = array<i32>} : memref<4x16xf32, #tpu.memory_space<vmem>>, vector<1x16xf32>,
      %c0_10 = arith.constant 0 : index
      %c0_11 = arith.constant 0 : index
      %c1 = arith.constant 1 : index
      %c0_12 = arith.constant 0 : index
      %c0_13 = arith.constant 0 : index
      %12 = vector.load %arg2[%c0_10, %c0_11, %c1, %c0_12, %c0_13] : memref<1x1x4x16x16xf32, #tpu.memory_space<vmem>>, vector<1x1x1x1x16xf32>
      %13 = vector.shape_cast %12 : vector<1x1x1x1x16xf32> to vector<1x16xf32>
      %c1_14 = arith.constant 1 : index
      %c0_15 = arith.constant 0 : index
      %14 = vector.load %arg5[%c1_14, %c0_15] : memref<4x16xf32, #tpu.memory_space<vmem>>, vector<1x16xf32>
      tpu.vector_store %arg5[%c1_14, %c0_15], %13 {strides = array<i32>} : memref<4x16xf32, #tpu.memory_space<vmem>>, vector<1x16xf32>,
      %c0_16 = arith.constant 0 : index
      %c0_17 = arith.constant 0 : index
      %c2 = arith.constant 2 : index
      %c0_18 = arith.constant 0 : index
      %c0_19 = arith.constant 0 : index
      %15 = vector.load %arg2[%c0_16, %c0_17, %c2, %c0_18, %c0_19] : memref<1x1x4x16x16xf32, #tpu.memory_space<vmem>>, vector<1x1x1x1x16xf32>
      %16 = vector.shape_cast %15 : vector<1x1x1x1x16xf32> to vector<1x16xf32>
      %c2_20 = arith.constant 2 : index
      %c0_21 = arith.constant 0 : index
      %17 = vector.load %arg5[%c2_20, %c0_21] : memref<4x16xf32, #tpu.memory_space<vmem>>, vector<1x16xf32>
      tpu.vector_store %arg5[%c2_20, %c0_21], %16 {strides = array<i32>} : memref<4x16xf32, #tpu.memory_space<vmem>>, vector<1x16xf32>,
      %c0_22 = arith.constant 0 : index
      %c0_23 = arith.constant 0 : index
      %c3 = arith.constant 3 : index
      %c0_24 = arith.constant 0 : index
      %c0_25 = arith.constant 0 : index
      %18 = vector.load %arg2[%c0_22, %c0_23, %c3, %c0_24, %c0_25] : memref<1x1x4x16x16xf32, #tpu.memory_space<vmem>>, vector<1x1x1x1x16xf32>
      %19 = vector.shape_cast %18 : vector<1x1x1x1x16xf32> to vector<1x16xf32>
      %c3_26 = arith.constant 3 : index
      %c0_27 = arith.constant 0 : index
      %20 = vector.load %arg5[%c3_26, %c0_27] : memref<4x16xf32, #tpu.memory_space<vmem>>, vector<1x16xf32>
      tpu.vector_store %arg5[%c3_26, %c0_27], %19 {strides = array<i32>} : memref<4x16xf32, #tpu.memory_space<vmem>>, vector<1x16xf32>,
    } else {
    }
    %c0_i32_1 = arith.constant 0 : i32
    %3 = arith.cmpi ne, %arg1, %c0_i32_1 : i32
    %4 = arith.extui %3 : i1 to i32
    %c0_i32_2 = arith.constant 0 : i32
    %5 = arith.cmpi ne, %4, %c0_i32_2 : i32
    scf.if %5 {
      %c0 = arith.constant 0 : index
      %c0_4 = arith.constant 0 : index
      %9 = vector.load %arg5[%c0, %c0_4] : memref<4x16xf32, #tpu.memory_space<vmem>>, vector<4x16xf32>
      %10 = vector.extract_strided_slice %9 {offsets = [0, 0], sizes = [1, 16], strides = [1, 1]} : vector<4x16xf32> to vector<1x16xf32>
      %c0_5 = arith.constant 0 : index
      %c0_6 = arith.constant 0 : index
      %c0_7 = arith.constant 0 : index
      %c0_8 = arith.constant 0 : index
      %c0_9 = arith.constant 0 : index
      %11 = vector.load %arg2[%c0_5, %c0_6, %c0_7, %c0_8, %c0_9] : memref<1x1x4x16x16xf32, #tpu.memory_space<vmem>>, vector<1x1x1x16x16xf32>
      %12 = vector.shape_cast %11 : vector<1x1x1x16x16xf32> to vector<16x16xf32>
      %cst = arith.constant dense<0.000000e+00> : vector<1x16xf32>
      %13 = tpu.matmul %10, %12, %cst {dimension_numbers = #tpu.dot_dimension_numbers<[1], [0], [0], [1], [0, 0, 1, 1], [], []>} : vector<1x16xf32>, vector<16x16xf32>, vector<1x16xf32> -> vector<1x16xf32>
      %c0_10 = arith.constant 0 : index
      %c0_11 = arith.constant 0 : index
      %14 = vector.load %arg5[%c0_10, %c0_11] : memref<4x16xf32, #tpu.memory_space<vmem>>, vector<1x16xf32>
      tpu.vector_store %arg5[%c0_10, %c0_11], %13 {strides = array<i32>} : memref<4x16xf32, #tpu.memory_space<vmem>>, vector<1x16xf32>,
      %15 = vector.extract_strided_slice %9 {offsets = [1, 0], sizes = [1, 16], strides = [1, 1]} : vector<4x16xf32> to vector<1x16xf32>
      %c0_12 = arith.constant 0 : index
      %c0_13 = arith.constant 0 : index
      %c1 = arith.constant 1 : index
      %c0_14 = arith.constant 0 : index
      %c0_15 = arith.constant 0 : index
      %16 = vector.load %arg2[%c0_12, %c0_13, %c1, %c0_14, %c0_15] : memref<1x1x4x16x16xf32, #tpu.memory_space<vmem>>, vector<1x1x1x16x16xf32>
      %17 = vector.shape_cast %16 : vector<1x1x1x16x16xf32> to vector<16x16xf32>
      %cst_16 = arith.constant dense<0.000000e+00> : vector<1x16xf32>
      %18 = tpu.matmul %15, %17, %cst_16 {dimension_numbers = #tpu.dot_dimension_numbers<[1], [0], [0], [1], [0, 0, 1, 1], [], []>} : vector<1x16xf32>, vector<16x16xf32>, vector<1x16xf32> -> vector<1x16xf32>
      %c1_17 = arith.constant 1 : index
      %c0_18 = arith.constant 0 : index
      %19 = vector.load %arg5[%c1_17, %c0_18] : memref<4x16xf32, #tpu.memory_space<vmem>>, vector<1x16xf32>
      tpu.vector_store %arg5[%c1_17, %c0_18], %18 {strides = array<i32>} : memref<4x16xf32, #tpu.memory_space<vmem>>, vector<1x16xf32>,
      %20 = vector.extract_strided_slice %9 {offsets = [2, 0], sizes = [1, 16], strides = [1, 1]} : vector<4x16xf32> to vector<1x16xf32>
      %c0_19 = arith.constant 0 : index
      %c0_20 = arith.constant 0 : index
      %c2 = arith.constant 2 : index
      %c0_21 = arith.constant 0 : index
      %c0_22 = arith.constant 0 : index
      %21 = vector.load %arg2[%c0_19, %c0_20, %c2, %c0_21, %c0_22] : memref<1x1x4x16x16xf32, #tpu.memory_space<vmem>>, vector<1x1x1x16x16xf32>
      %22 = vector.shape_cast %21 : vector<1x1x1x16x16xf32> to vector<16x16xf32>
      %cst_23 = arith.constant dense<0.000000e+00> : vector<1x16xf32>
      %23 = tpu.matmul %20, %22, %cst_23 {dimension_numbers = #tpu.dot_dimension_numbers<[1], [0], [0], [1], [0, 0, 1, 1], [], []>} : vector<1x16xf32>, vector<16x16xf32>, vector<1x16xf32> -> vector<1x16xf32>
      %c2_24 = arith.constant 2 : index
      %c0_25 = arith.constant 0 : index
      %24 = vector.load %arg5[%c2_24, %c0_25] : memref<4x16xf32, #tpu.memory_space<vmem>>, vector<1x16xf32>
      tpu.vector_store %arg5[%c2_24, %c0_25], %23 {strides = array<i32>} : memref<4x16xf32, #tpu.memory_space<vmem>>, vector<1x16xf32>,
      %25 = vector.extract_strided_slice %9 {offsets = [3, 0], sizes = [1, 16], strides = [1, 1]} : vector<4x16xf32> to vector<1x16xf32>
      %c0_26 = arith.constant 0 : index
      %c0_27 = arith.constant 0 : index
      %c3 = arith.constant 3 : index
      %c0_28 = arith.constant 0 : index
      %c0_29 = arith.constant 0 : index
      %26 = vector.load %arg2[%c0_26, %c0_27, %c3, %c0_28, %c0_29] : memref<1x1x4x16x16xf32, #tpu.memory_space<vmem>>, vector<1x1x1x16x16xf32>
      %27 = vector.shape_cast %26 : vector<1x1x1x16x16xf32> to vector<16x16xf32>
      %cst_30 = arith.constant dense<0.000000e+00> : vector<1x16xf32>
      %28 = tpu.matmul %25, %27, %cst_30 {dimension_numbers = #tpu.dot_dimension_numbers<[1], [0], [0], [1], [0, 0, 1, 1], [], []>} : vector<1x16xf32>, vector<16x16xf32>, vector<1x16xf32> -> vector<1x16xf32>
      %c3_31 = arith.constant 3 : index
      %c0_32 = arith.constant 0 : index
      %29 = vector.load %arg5[%c3_31, %c0_32] : memref<4x16xf32, #tpu.memory_space<vmem>>, vector<1x16xf32>
      tpu.vector_store %arg5[%c3_31, %c0_32], %28 {strides = array<i32>} : memref<4x16xf32, #tpu.memory_space<vmem>>, vector<1x16xf32>,
    } else {
    }
    %c2_i32 = arith.constant 2 : i32
    %6 = arith.cmpi eq, %arg1, %c2_i32 : i32
    %7 = arith.extui %6 : i1 to i32
    %c0_i32_3 = arith.constant 0 : i32
    %8 = arith.cmpi ne, %7, %c0_i32_3 : i32
    scf.if %8 {
      %9 = tpu.iota {dimensions = array<i32: 1>} : vector<4x16xi32>
      %10 = tpu.iota {dimensions = array<i32: 1>} : vector<1x8xi32>
      %c0 = arith.constant 0 : index
      %c0_4 = arith.constant 0 : index
      %11 = vector.load %arg5[%c0, %c0_4] : memref<4x16xf32, #tpu.memory_space<vmem>>, vector<4x16xf32>
      %c0_i32_5 = arith.constant 0 : i32
      %12 = vector.broadcast %c0_i32_5 : i32 to vector<4x16xi32>
      %13 = arith.cmpi eq, %9, %12 : vector<4x16xi32>
      %cst = arith.constant 0xFF800000 : f32
      %14 = vector.broadcast %cst : f32 to vector<4x16xf32>
      %15 = arith.select %13, %14, %11 : vector<4x16xi1>, vector<4x16xf32>
      %cst_6 = arith.constant 0.000000e+00 : f32
      %16 = vector.broadcast %cst_6 : f32 to vector<4x16xf32>
      %cst_7 = arith.constant 0.000000e+00 : f32
      %17 = vector.broadcast %cst_7 : f32 to vector<1x8xf32>
      %c0_i32_8 = arith.constant 0 : i32
      %c8_i32 = arith.constant 8 : i32
      %18 = arith.addi %c0_i32_8, %c8_i32 : i32
      %c1_i32 = arith.constant 1 : i32
      %19:3 = scf.for %arg6 = %c0_i32_8 to %18 step %c1_i32 iter_args(%arg7 = %15, %arg8 = %16, %arg9 = %17) -> (vector<4x16xf32>, vector<4x16xf32>, vector<1x8xf32>)  : i32 {
        %cst_17 = arith.constant dense<0xFF800000> : vector<4xf32>
        %27 = vector.multi_reduction <maximumf>, %arg7, %cst_17 [1] : vector<4x16xf32> to vector<4xf32>
        %28 = vector.shape_cast %27 : vector<4xf32> to vector<4x1xf32>
        %29 = vector.broadcast %28 : vector<4x1xf32> to vector<4x16xf32>
        %30 = arith.cmpf oeq, %arg7, %29 : vector<4x16xf32>
        %c16_i32 = arith.constant 16 : i32
        %31 = vector.broadcast %c16_i32 : i32 to vector<4x16xi32>
        %32 = arith.select %30, %9, %31 : vector<4x16xi1>, vector<4x16xi32>
        %cst_18 = arith.constant dense<2147483647> : vector<4xi32>
        %33 = vector.multi_reduction <minsi>, %32, %cst_18 [1] : vector<4x16xi32> to vector<4xi32>
        %34 = vector.shape_cast %33 : vector<4xi32> to vector<4x1xi32>
        %c1_i32_19 = arith.constant 1 : i32
        %35 = vector.broadcast %c1_i32_19 : i32 to vector<4x1xi32>
        %36 = arith.subi %34, %35 : vector<4x1xi32>
        %37 = vector.broadcast %36 : vector<4x1xi32> to vector<4x16xi32>
        %38 = arith.cmpi eq, %9, %37 : vector<4x16xi32>
        %cst_20 = arith.constant 1.000000e+00 : f32
        %39 = vector.broadcast %cst_20 : f32 to vector<4x16xf32>
        %40 = arith.select %38, %39, %arg8 : vector<4x16xi1>, vector<4x16xf32>
        %41 = vector.broadcast %34 : vector<4x1xi32> to vector<4x16xi32>
        %42 = arith.cmpi eq, %9, %41 : vector<4x16xi32>
        %cst_21 = arith.constant 0xFF800000 : f32
        %43 = vector.broadcast %cst_21 : f32 to vector<4x16xf32>
        %44 = arith.select %42, %43, %arg7 : vector<4x16xi1>, vector<4x16xf32>
        %45 = vector.broadcast %arg6 : i32 to vector<1x8xi32>
        %46 = arith.cmpi eq, %10, %45 : vector<1x8xi32>
        %47 = vector.extract_strided_slice %28 {offsets = [3, 0], sizes = [1, 1], strides = [1, 1]} : vector<4x1xf32> to vector<1x1xf32>
        %48 = vector.shape_cast %47 : vector<1x1xf32> to vector<1x1xf32>
        %49 = vector.broadcast %48 : vector<1x1xf32> to vector<1x8xf32>
        %50 = arith.select %46, %49, %arg9 : vector<1x8xi1>, vector<1x8xf32>
        scf.yield %44, %40, %50 : vector<4x16xf32>, vector<4x16xf32>, vector<1x8xf32>
      }
      %c8_i32_9 = arith.constant 8 : i32
      %cst_10 = arith.constant dense<0xFF800000> : vector<16xf32>
      %20 = vector.multi_reduction <maximumf>, %19#1, %cst_10 [0] : vector<4x16xf32> to vector<16xf32>
      %21 = vector.shape_cast %20 : vector<16xf32> to vector<1x16xf32>
      %22 = arith.fptosi %21 : vector<1x16xf32> to vector<1x16xi32>
      %23 = vector.shape_cast %22 : vector<1x16xi32> to vector<1x1x16xi32>
      %c0_11 = arith.constant 0 : index
      %c0_12 = arith.constant 0 : index
      %c0_13 = arith.constant 0 : index
      %24 = vector.load %arg4[%c0_11, %c0_12, %c0_13] : memref<1x1x16xi32, #tpu.memory_space<vmem>>, vector<1x1x16xi32>
      tpu.vector_store %arg4[%c0_11, %c0_12, %c0_13], %23 {strides = array<i32>} : memref<1x1x16xi32, #tpu.memory_space<vmem>>, vector<1x1x16xi32>,
      %25 = vector.shape_cast %19#2 : vector<1x8xf32> to vector<1x1x8xf32>
      %c0_14 = arith.constant 0 : index
      %c0_15 = arith.constant 0 : index
      %c0_16 = arith.constant 0 : index
      %26 = vector.load %arg3[%c0_14, %c0_15, %c0_16] : memref<1x1x8xf32, #tpu.memory_space<vmem>>, vector<1x1x8xf32>
      tpu.vector_store %arg3[%c0_14, %c0_15, %c0_16], %25 {strides = array<i32>} : memref<1x1x8xf32, #tpu.memory_space<vmem>>, vector<1x1x8xf32>,
    } else {
    }
    return
  }
  func.func @transform_0(%arg0: i32, %arg1: i32) -> (i32, i32, i32, i32, i32) {
    %c2_i32 = arith.constant 2 : i32
    %0 = arith.subi %c2_i32, %arg1 : i32
    %c0_i32 = arith.constant 0 : i32
    %c0_i32_0 = arith.constant 0 : i32
    %c0_i32_1 = arith.constant 0 : i32
    %c0_i32_2 = arith.constant 0 : i32
    return %0, %arg0, %c0_i32, %c0_i32_0, %c0_i32_1 : i32, i32, i32, i32, i32
  }
  func.func @transform_1(%arg0: i32, %arg1: i32) -> (i32, i32, i32) {
    %c0_i32 = arith.constant 0 : i32
    %c0_i32_0 = arith.constant 0 : i32
    %c0_i32_1 = arith.constant 0 : i32
    return %arg0, %c0_i32, %c0_i32_0 : i32, i32, i32
  }
  func.func @transform_2(%arg0: i32, %arg1: i32) -> (i32, i32, i32) {
    %c0_i32 = arith.constant 0 : i32
    %c0_i32_0 = arith.constant 0 : i32
    %c0_i32_1 = arith.constant 0 : i32
    return %arg0, %c0_i32, %c0_i32_0 : i32, i32, i32
  }
}

</mosaic_0001>

<bundles_post_ra>
// kernel: tpu_custom_call.1
= control target key start
LH: loop header
LB: loop body
LE: loop exit
PB: predicated region body
PF: predicated region fallthrough
CT: control target
= control target key end

     0   :  { %8 = vsyncpa [#allocation4], 0  ;;  %s1178_s0 = inlined_call_operand.hbm [shape: f32[3,2,4,16,16], index: 0, kind: input, shape index: {}]   ;;  %s1179_s1 = inlined_call_operand.hbm [shape: f32[2,1,8], index: 1, kind: output, shape index: {0}]   ;;  %s1180_s2 = inlined_call_operand.hbm [shape: s32[2,1,16], index: 2, kind: output, shape index: {1}]  }
   0x1   :  { %10 = vsyncpa [#allocation4 + $0x1], 0 }
   0x2   :  { %11 = vsyncpa [#allocation5], 0 }
   0x3   :  { %13 = vsyncpa [#allocation5 + $0x1], 0 }
   0x4   :  { %14 = vsyncpa [#allocation8], 0 }
   0x5   :  { %16 = vsyncpa [#allocation8 + $0x1], 0  ;;  %s945_s9 = smov 0   ;;  %s947_s10 = smov 0  }
   0x6   :  { %s949_s11 = smov 0   ;;  %s951_s12 = smov 0  }
   0x7   :  { %s953_s13 = smov 0   ;;  %s955_s14 = smov 0  }
   0x8   :  { %s957_s15 = smov 0   ;;  %s959_s16 = smov 0  }
   0x9   :  { %s961_s17 = smov 0   ;;  %s963_s18 = smov 0  }
   0xa   :  { %s965_s19 = smov 0  }
   0xb LB: > { %1185 = sst [smem:[#allocation12_spill]] %s878_s11  ;;  %s535_s20 = sadd.s32 4294967295, %s910_s19   ;;  %s910_s19 = sphi %s965_s19, %s22_s19   ;;  %s906_s18 = sphi %s963_s18, %s1208_s18   ;;  %s902_s17 = sphi %s961_s17, %s1207_s17   ;;  %s898_s16 = sphi %s959_s16, %s1206_s16   ;;  %s894_s15 = sphi %s957_s15, %s1205_s15   ;;  %s890_s14 = sphi %s955_s14, %s1198_s14   ;;  %s886_s13 = sphi %s953_s13, %s1204_s13   ;;  %s882_s12 = sphi %s951_s12, %s1203_s12   ;;  %s878_s11 = sphi %s949_s11, %s1196_s11   ;;  %s874_s10 = sphi %s947_s10, %s1202_s10   ;;  %s870_s9 = sphi %s945_s9, %s1201_s9  }
   0xc   : > { %1186 = sst [smem:[#allocation13_spill]] %s890_s14  ;;  %s536_s21 = sadd.s32 4294967294, %s910_s19  }
   0xd   : > { %s31_s22 = sadd.s32 1, %s902_s17  ;;  %s34_s23 = sadd.s32 1, %s906_s18 }
   0xe   : > { %p32_p0 = scmp.ge.s32.totalorder %s31_s22, 3  ;;  %s38_s24 = ssub.s32 2, %s902_s17 }
   0xf   : > { %s45_s25 = sadd.s32 1, %s890_s14  ;;  %p52_p1 = scmp.ne.s32.totalorder %s890_s14, %s886_s13 }
  0x10   : > { %s1210_s22 = smov (%p32_p0, %s31_s22), 0  ;;  %s1212_s23 = smov (!%p32_p0, %s34_s23), %s906_s18 }
  0x11   : > { %1187 = sst [smem:[#allocation14_spill]] %s1210_s22  ;;  %s39_s26 = ssub.s32 2, %s1210_s22 }
  0x12   : > { %p53_p2 = scmp.eq.s32.totalorder %s910_s19, 0  ;;  %p36_p3 = scmp.ge.s32.totalorder %s1212_s23, 2 }
  0x13   : > { %s40_s27 = ssub.s32 %s38_s24, %s39_s26  ;;  %p58_p5 = scmp.ne.s32.totalorder %s886_s13, %s882_s12 }
  0x14   : > { %p1015_p4 = por %p53_p2, %p52_p1  ;;  %s1214_s23 = smov (%p36_p3, %s1212_s23), 0 }
  0x15   : > { %1189 = sst [smem:[#allocation15_spill]] %s1214_s23  ;;  %p59_p6 = scmp.eq.s32.totalorder %s535_s20, 0 }
  0x16   : > { %s71_s29 = sadd.s32 1, %s878_s11  ;;  %s41_s30 = ssub.s32 %s906_s18, %s1214_s23 }
  0x17   : > { %p81_p7 = scmp.ne.s32.totalorder %s878_s11, %s874_s10  ;;  %s42_s3 = sor.u32 %s41_s30, %s40_s27 }
  0x18   : > { %p1028_p8 = por %p59_p6, %p58_p5  ;;  %p43_p9 = scmp.eq.s32.totalorder %s42_s3, 0 }
  0x19   : > { %p69_p10 = scmp.eq.s32.totalorder %s41_s30, 0  ;;  %p82_p11 = scmp.eq.s32.totalorder %s535_s20, 5 }
  0x1a   : > { %p87_p12 = scmp.ne.s32.totalorder %s874_s10, %s870_s9  ;;  %p88_p0 = scmp.eq.s32.totalorder %s536_s21, 5 }
  0x1b   : > { %s1035_s5 = scalar_select %p43_p9, %s890_s14, %s45_s25  }
  0x1c   : > { %s1038_s6 = scalar_select %p69_p10, %s878_s11, %s71_s29  }
  0x1d   : > { %1191 = sst [smem:[#allocation16_spill]] %s1035_s5  ;;  %p1040_p13 = por %p82_p11, %p81_p7 }
  0x1e   : > { %1192 = sst [smem:[#allocation17_spill]] %s1038_s6  ;;  %p586_p1 = scmp.lt.s32.totalorder %s910_s19, 6 }
  0x1f   : > { %p1045_p2 = por %p88_p0, %p87_p12  ;;  %s134_s12 = sand.u32 1, %s890_s14  }
  0x20   : > { %s539_s26 = sshll.u32 %s134_s12, 6  ;;  %s540_s20 = sshll.u32 %s906_s18, 3 }
  0x21   : > { %s541_s25 = sshll.u32 %s38_s24, 4  ;;  %s138_s27 = scalar_lea.vmem [#allocation3], %s539_s26 }
  0x22   : > { %s149_s29 = sshll.u32 %s138_s27, 4  ;;  %s144_s30 = sadd.s32 %s541_s25, %s540_s20  ;;  %s150_s29 = int_to_ptr.vmem [resolvable:$true] %s149_s29 }
  0x23   : > { %s542_s3 = sshll.u32 %s144_s30, 3  ;;  %p576_p3 = pnand %p586_p1, %p1015_p4 }
  0x24   : > { %s146_s22 = scalar_lea.hbm %s1178_s0, %s542_s3  ;;  %s135_s14 = scalar_lea.sflag [#allocation4], %s134_s12 }
  0x25   : > { %s147_s5 = sshll.u32 %s146_s22, 4  ;;  %s928_s6 = smov 128   ;;  %s148_s5 = int_to_ptr.hbm [resolvable:$true] %s147_s5 }
  0x26   : > { %s929_s11 = smov 8   ;;  %p543_p5 = scmp.ge.s32.totalorder %s910_s19, 1 }
  0x27   : > { %578 = dma.hbm_to_vmem [thread:$0]  (!%p576_p3), %s148_s5, 1024, %s150_s29, %s135_s14, %s928_s6, %s928_s6, %s929_s11  }
  0x28   : > { %p157_p6 = scmp.lt.s32.totalorder %s910_s19, 7 }
  0x2a   : > { %p158_p7 = pnand %p543_p5, %p157_p6 }
  0x2b   : > { %s163_s24 = sand.u32 (!%p158_p7), 1, %s886_s13  }
  0x2c   : > { %161 = sbr.rel (%p158_p7) target bundleno = 635 (0x27b), region = 24  ;;  %s544_s26 = sshll.u32 (!%p158_p7), %s163_s24, 6 }
  0x2d   : > { %s164_s28 = scalar_lea.sflag (!%p158_p7), [#allocation4], %s163_s24  ;;  %s1061_s20 = scalar_lea.vmem (!%p158_p7), [#allocation3], %s544_s26 }
  0x31   : > { %857 = dma.done.wait (%p1028_p8), %s164_s28, 1024  }
  0x32   : > { %859 = vsyncadd (%p1028_p8), %s164_s28, 4294966272  ;;  %s1068_s22 = sand.u32 1, %s874_s10   ;;  %p545_p4 = scmp.ne.s32.totalorder %s894_s15, 0 }
  0x33   : > { %s185_s11 = scalar_lea.vmem [#allocation6], %s1068_s22  ;;  %s191_s14 = scalar_lea.vmem [#allocation7], %s1068_s22 }
  0x34   : > { %196 = sbr.rel (%p545_p4) target bundleno = 62 (0x3e), region = 32 }
  0x39   : > { %v197_v0 = vld [vmem:[%s1061_s20] sm:$0x1]  ;;  %vm198_vm0 = vcmask 122880   ;;  %v546_v1 = vld [vmem:[%s1061_s20 + $0x10] sm:$0x1] }
  0x3a   : > { %199 = vst.msk [vmem:[#allocation2] sm:$0x1] %vm198_vm0, %v197_v0  ;;  %v547_v2 = vld [vmem:[%s1061_s20 + $0x20] sm:$0x1]  ;;  %v548_v3 = vld [vmem:[%s1061_s20 + $0x30] sm:$0x1] }
  0x3b   : > { %202 = vst.msk [vmem:[#allocation2 + $0x1] sm:$0x1] %vm198_vm0, %v546_v1 }
  0x3c   : > { %205 = vst.msk [vmem:[#allocation2 + $0x2] sm:$0x1] %vm198_vm0, %v547_v2 }
  0x3d   : > { %208 = vst.msk [vmem:[#allocation2 + $0x3] sm:$0x1] %vm198_vm0, %v548_v3 }
  0x3e PF: > { %p549_p8 = scmp.eq.s32.totalorder %s894_s15, 0 }
  0x40   : > { %212 = sbr.rel (%p549_p8) target bundleno = 207 (0xcf), region = 36 }
  0x45   : > { %v555_v4 = vld [vmem:[%s1061_s20 + $0x28] sm:$0xff]  ;;  %v558_v5 = vld [vmem:[%s1061_s20 + $0x38] sm:$0xff]  ;;  %v554_v6 = vld [vmem:[%s1061_s20 + $0x20] sm:$0xff]  ;;  %vm216_vm1 = vcmask 130048   ;;  %vm240_vm2 = vcmask 122880  }
  0x46   : > { %289 = vmatpush.msra.mxu2 %v555_v4  ;;  %316 = vmatpush.msra.mxu3 %v558_v5  ;;  %v557_v7 = vld [vmem:[%s1061_s20 + $0x30] sm:$0xff]  ;;  %v213_v8 = vld [vmem:[#allocation2] sm:$0xf]  ;;  %v215_v9 = vld [vmem:[%s1061_s20 + $0x8] sm:$0xff] }
  0x47   : > { %v272_v10 = vrot.slane %v213_v8, 2  ;;  %v299_v11 = vrot.slane %v213_v8, 3  ;;  %234 = vmatpush.msra.mxu0 %v215_v9  ;;  %v552_v12 = vld [vmem:[%s1061_s20 + $0x18] sm:$0xff]  ;;  %v214_v13 = vld [vmem:[%s1061_s20] sm:$0xff]  ;;  %v551_v14 = vld [vmem:[%s1061_s20 + $0x10] sm:$0xff]  ;;  %v245_v15 = vrot.slane %v213_v8, 1 }
  0x48   : > { %290 = vmatpush.msra.mxu2 %v554_v6  ;;  %317 = vmatpush.msra.mxu3 %v557_v7 }
  0x49   : > { %556 = vmatmul.msk.f32.vlgmr.msra.gmra.mxu2 %vm216_vm1, %v272_v10  ;;  %559 = vmatmul.msk.f32.vlgmr.msra.gmra.mxu3 %vm216_vm1, %v299_v11 }
  0x4a   : > { %262 = vmatpush.msra.mxu1 %v552_v12  ;;  %235 = vmatpush.msra.mxu0 %v214_v13 }
  0x4b   : > { %550 = vmatmul.msk.f32.vlgmr.msra.gmra.mxu0 %vm216_vm1, %v213_v8 }
  0x4c   : > { %263 = vmatpush.msra.mxu1 %v551_v14 }
  0x4d   : > { %553 = vmatmul.msk.f32.vlgmr.msra.gmra.mxu1 %vm216_vm1, %v245_v15 }
  0xc8   : > { %v237_v16 = vpop.f32.mrf.mxu0 }
  0xc9   : > { %241 = vst.msk [vmem:[#allocation2] sm:$0x1] %vm240_vm2, %v237_v16 }
  0xca   : > { %v265_v17 = vpop.f32.mrf.mxu1 }
  0xcb   : > { %268 = vst.msk [vmem:[#allocation2 + $0x1] sm:$0x1] %vm240_vm2, %v265_v17 }
  0xcc   : > { %v292_v18 = vpop.f32.mrf.mxu2  ;;  %v319_v19 = vpop.f32.mrf.mxu3 }
  0xcd   : > { %295 = vst.msk [vmem:[#allocation2 + $0x2] sm:$0x1] %vm240_vm2, %v292_v18 }
  0xce   : > { %322 = vst.msk [vmem:[#allocation2 + $0x3] sm:$0x1] %vm240_vm2, %v319_v19 }
  0xcf PF: > { %p560_p9 = scmp.ne.s32.totalorder %s894_s15, 2 }
  0xd0   : > { %s1091_s23 = smov (!%p560_p9), 0  }
  0xd1   : > { %326 = sbr.rel (%p560_p9) target bundleno = 607 (0x25f), region = 40 }
  0xd6   : > { %v327_v20 = vlaneseq  ;;  %v329_v22 = vld [vmem:[#allocation2] sm:$0xf]  ;;  %v912_v24 = vmov 0.0   ;;  %v916_v25 = vmov 0.0  }
  0xd8   : > { %v328_v21 = vand.u32 127, %v327_v20 }
  0xda   : > { %vm330_vm3 = vcmp.eq.s32.totalorder %v328_v21, 0 }
  0xdb   : > { %v331_v23 = vsel %vm330_vm3, -inf, %v329_v22  }
  0xdc   : > { %v920_v26 = vmov %v331_v23  }
  0xdd LB: >> { %vm341_vm4 = vcmask 125952   ;;  %v367_v28 = vstv %s926_s23  ;;  %s337_s23 = sadd.s32 1, %s926_s23   ;;  %s926_s23 = sphi %s1091_s23, %s337_s23   ;;  %v922_v26 = vphi %v920_v26, %v366_v26   ;;  %v918_v25 = vphi %v916_v25, %v917_v25   ;;  %v914_v24 = vphi %v912_v24, %v913_v24  }
  0xde   : >> { %v342_v27 = vsel %vm341_vm4, %v922_v26, -inf  ;;  %vm368_vm5 = vcmp.eq.s32.totalorder %v328_v21, %v367_v28  ;;  %p334_p10 = scmp.ge.s32.totalorder %s337_s23, 8  }
  0xdf   : >> { %343 = vmax.xlane.f32.xlu0 %v342_v27  ;;  %vm381_vm10 = vcmask (%p334_p10), 60419   ;;  %vm379_vm12 = vcmask (%p334_p10), 122880  }
 0x152   : >> { %v344_v29 = vpop.xlane.xlu0 %343 }
 0x153   : >> { %vm345_vm6 = vcmp.eq.f32.partialorder %v922_v26, %v344_v29  ;;  %v369_v30 = vsel %vm368_vm5, %v344_v29, %v914_v24  }
 0x154   : >> { %v346_v31 = vsel %vm345_vm6, %v328_v21, 16  ;;  %v913_v24 = vmov %v369_v30   ;;  %382 = vst.msk [vmem:[%s185_s11 - $0x3] sm:$0x8] (%p334_p10), %vm381_vm10, %v369_v30 }
 0x155   : >> { %v347_v32 = vsel %vm341_vm4, %v346_v31, 2147483647 }
 0x156   : >> { %v349_v33 = vshra.s32 %v347_v32, 16  ;;  %v348_v35 = vand.u32 65535, %v347_v32 }
 0x158   : >> { %v351_v34 = vcvt.s32.f32 %v349_v33  ;;  %v350_v37 = vcvt.s32.f32 %v348_v35 }
 0x15a   : >> { %352 = vmin.xlane.f32.xlu0 %v351_v34 }
 0x1cd   : >> { %v353_v36 = vpop.xlane.xlu0 %352 }
 0x1ce   : >> { %vm354_vm7 = vcmp.eq.f32.partialorder %v351_v34, %v353_v36  ;;  %v359_v39 = vcvt.f32.s32 %v353_v36 }
 0x1cf   : >> { %v355_v38 = vsel %vm354_vm7, %v350_v37, inf }
 0x1d0   : >> { %356 = vmin.xlane.f32.xlu1 %v355_v38  ;;  %v360_v41 = vshll.u32 %v359_v39, 16 }
 0x243   : >> { %v357_v40 = vpop.xlane.xlu1 %356 }
 0x244   : >> { %v358_v42 = vcvt.f32.s32 %v357_v40 }
 0x246   : >> { %v361_v43 = vadd.s32 %v360_v41, %v358_v42 }
 0x248   : >> { %v561_v44 = vadd.s32 4294967295, %v361_v43  ;;  %vm365_vm8 = vcmp.eq.s32.totalorder %v328_v21, %v361_v43  ;;  %336 = sbr.rel (!%p334_p10) target bundleno = 221 (0xdd), region = 111 }
 0x249   : >> { %v366_v26 = vsel %vm365_vm8, -inf, %v922_v26  }
 0x24a   : >> { %vm363_vm9 = vcmp.eq.s32.totalorder %v328_v21, %v561_v44 }
 0x24b   : >> { %v364_v45 = vsel %vm363_vm9, 1.0, %v918_v25  }
 0x24c   : >> { %v917_v25 = vmov %v364_v45   ;;  %v371_v46 = vsel (%p334_p10), %vm341_vm4, %v364_v45, -inf }
 0x24d   : > { %v372_v47 = vrot.slane %v371_v46, 4 }
 0x24f   : > { %v373_v48 = vmax.f32 %v371_v46, %v372_v47 }
 0x251   : > { %v374_v49 = vrot.slane %v373_v48, 2 }
 0x253   : > { %v375_v50 = vmax.f32 %v373_v48, %v374_v49 }
 0x255   : > { %v376_v51 = vrot.slane %v375_v50, 1 }
 0x257   : > { %v377_v52 = vmax.f32 %v375_v50, %v376_v51 }
 0x259   : > { %vm564_vm11 = vcmp.lt.s32.totalorder %v377_v52, 0  ;;  %v565_v53 = vceil.f32 %v377_v52  ;;  %v566_v54 = vfloor.f32 %v377_v52 }
 0x25b   : > { %v567_v55 = vsel %vm564_vm11, %v565_v53, %v566_v54 }
 0x25c   : > { %v568_v56 = vcvt.f32.s32 %v567_v55 }
 0x25e   : > { %380 = vst.msk [vmem:[%s191_s14] sm:$0x1] %vm379_vm12, %v568_v56 }
 0x25f PF: > { %s396_s5 = scalar_lea.hbm %s1179_s1, %s898_s16  ;;  %s398_s6 = sshll.u32 %s185_s11, 4  ;;  %s399_s6 = int_to_ptr.vmem [resolvable:$true] %s398_s6 }
 0x260   : > { %s400_s12 = sshll.u32 %s396_s5, 4  ;;  %s384_s25 = scalar_lea.sflag [#allocation5], %s1068_s22  ;;  %s401_s12 = int_to_ptr.hbm [resolvable:$true] %s400_s12 }
 0x261   : > { %s754_s27 = sshra.s32 %s401_s12, 4  ;;  %s760_s21 = scalar_lea.hbm %s1179_s1, 2  ;;  %s755_s27 = int_to_ptr.hbm [resolvable:$true] %s754_s27 }
 0x262   : > { %s756_s29 = scalar_lea.hbm %s755_s27, 1  ;;  %p761_p1 = scmp.lt.s32.totalorder %s755_s27, %s1179_s1 }
 0x263   : > { %p757_p11 = scmp.ne.s32.totalorder %s755_s27, %s756_s29  ;;  %p762_p3 = scmp.lt.s32.totalorder %s760_s21, %s756_s29 }
 0x265   : > { %p758_p12 = pnand %p757_p11, %p1040_p13  ;;  %p763_p5 = por %p762_p3, %p761_p1 }
 0x267   : > { %p759_p0 = pneg %p758_p12 }
 0x269   : > { %p764_p6 = pnand %p763_p5, %p759_p0 }
 0x26b   : > { %767 = shalt.err (!%p764_p6)
}
 0x26c   : > { %571 = dma.vmem_to_hbm [thread:$0]  (%p1040_p13), %s399_s6, 16, %s401_s12, %s384_s25  }
 0x26d   : > { %s409_s11 = scalar_lea.hbm %s1180_s2, %s898_s16  ;;  %s411_s23 = sshll.u32 %s191_s14, 4  ;;  %s412_s23 = int_to_ptr.vmem [resolvable:$true] %s411_s23 }
 0x26e   : > { %s413_s15 = sshll.u32 %s409_s11, 4  ;;  %s388_s4 = scalar_lea.sflag [#allocation8], %s1068_s22  ;;  %s414_s15 = int_to_ptr.hbm [resolvable:$true] %s413_s15 }
 0x26f   : > { %s782_s5 = sshra.s32 %s414_s15, 4  ;;  %s788_s6 = scalar_lea.hbm %s1180_s2, 2  ;;  %s783_s5 = int_to_ptr.hbm [resolvable:$true] %s782_s5 }
 0x270   : > { %s784_s27 = scalar_lea.hbm %s783_s5, 1  ;;  %p789_p9 = scmp.lt.s32.totalorder %s783_s5, %s1180_s2 }
 0x271   : > { %p785_p7 = scmp.ne.s32.totalorder %s783_s5, %s784_s27  ;;  %p790_p10 = scmp.lt.s32.totalorder %s788_s6, %s784_s27 }
 0x273   : > { %p786_p4 = pnand %p785_p7, %p1040_p13  ;;  %p791_p11 = por %p790_p10, %p789_p9 }
 0x275   : > { %p787_p8 = pneg %p786_p4 }
 0x277   : > { %p792_p12 = pnand %p791_p11, %p787_p8 }
 0x279   : > { %795 = shalt.err (!%p792_p12)
}
 0x27a   : > { %572 = dma.vmem_to_hbm [thread:$0]  (%p1040_p13), %s412_s23, 16, %s414_s15, %s388_s4  }
 0x27b PF: > { %p587_p0 = scmp.ge.s32.totalorder %s910_s19, 2  ;;  %s425_s16 = sand.u32 1, %s870_s9  }
 0x27c   : > { %s426_s22 = scalar_lea.sflag [#allocation5], %s425_s16 }
 0x27d   : > { %p580_p1 = pnand %p587_p0, %p1045_p2 }
 0x27f   : > { %p581_p3 = pneg %p580_p1 }
 0x281   : > { %861 = dma.done.wait (%p581_p3), %s426_s22, 16  }
 0x282   : > { %863 = vsyncadd (%p581_p3), %s426_s22, 4294967280  ;;  %s435_s14 = scalar_lea.sflag [#allocation8], %s425_s16 }
 0x283   : > { %865 = dma.done.wait (%p581_p3), %s435_s14, 16  }
 0x284   : > { %867 = vsyncadd (%p581_p3), %s435_s14, 4294967280  ;;  %s22_s19 = sadd.s32 1, %s910_s19   ;;  %s1195_s7 = sld [smem:[#allocation12_spill]] }
 0x285   : > { %p19_p5 = scmp.ge.s32.totalorder %s22_s19, 8   ;;  %s1196_s11 = sld [smem:[#allocation17_spill]] }
 0x286   : > { %s1197_s3 = sld [smem:[#allocation13_spill]]  ;;  %s1201_s9 = smov %s874_s10 }
 0x287   : > { %s1198_s14 = sld [smem:[#allocation16_spill]]  ;;  %s1203_s12 = smov %s886_s13 }
 0x288   : > { %s1199_s8 = sld [smem:[#allocation14_spill]]  ;;  %s1205_s15 = smov %s902_s17 }
 0x289   : > { %s1200_s21 = sld [smem:[#allocation15_spill]]  ;;  %s1206_s16 = smov %s906_s18 }
 0x28a   : > { %s1202_s10 = smov %s1195_s7 }
 0x28b   :  { %21 = sbr.rel (!%p19_p5) target bundleno = 11 (0xb), region = 122 }
 0x28c   : > { %s1204_s13 = smov %s1197_s3 }
 0x28e   : > { %s1207_s17 = smov %s1199_s8 }
 0x28f   : > { %s1208_s18 = smov %s1200_s21 }
 0x290   :  { %440 = vsyncpa [#allocation4], 1 }
 0x291   :  { %442 = vsyncpa [#allocation4 + $0x1], 1 }
 0x292   :  { %443 = vsyncpa [#allocation5], 1 }
 0x293   :  { %445 = vsyncpa [#allocation5 + $0x1], 1 }
 0x294   :  { %446 = vsyncpa [#allocation8], 1 }
 0x295   :  { %448 = vsyncpa [#allocation8 + $0x1], 1 }

</bundles_post_ra>
